<compile_context>
chip_gen: v7x
topology: tpu7x:2x2x1
jax: 0.10.0
libtpu: 0.0.40
codegen_flags: <defaults>
</compile_context>

<pallas_src>
import jax
import jax.numpy as jnp
from jax import lax
from jax.experimental import pallas as pl
from jax.experimental.pallas import tpu as pltpu

NUM_CHARS = 41
INPUT_DIM = 16
HIDDEN_DIM = 16
OUTPUT_DIM = 16


# ----------------------------------------------------------------------------
# Pallas kernel: bidirectional LSTM recurrence (input proj pre-folded) + linear.
# ----------------------------------------------------------------------------
def char_lstm_kernel(xg_ref,      # (T, tB, 8H) f32: [x@Wih_f + b_f | x@Wih_b + b_b]
                     whh_f_ref,   # (H, 4H)
                     whh_b_ref,   # (H, 4H)
                     wlin_ref,    # (2H, O)
                     o_ref):      # (tB, O)
    T, B, _ = xg_ref.shape
    H = HIDDEN_DIM
    G = 4 * H

    whh_f = whh_f_ref[...]
    whh_b = whh_b_ref[...]

    def lstm_step(gx, h, c, whh):
        # gx already holds x_t @ Wih + (b_ih + b_hh); only h @ Whh is left on the
        # serial h->h chain (a single MXU push per step).
        gates = gx + jnp.dot(h, whh, preferred_element_type=jnp.float32)   # (B, 4H)
        # Two wide EUP pushes over the whole gate block instead of four narrow ones.
        sig = jax.nn.sigmoid(gates)
        tah = jnp.tanh(gates)
        i = sig[:, 0 * H:1 * H]
        f = sig[:, 1 * H:2 * H]
        g = tah[:, 2 * H:3 * H]
        o = sig[:, 3 * H:4 * H]
        c_new = f * c + i * g
        h_new = o * jnp.tanh(c_new)                 # third (and last) EUP push
        return h_new, c_new

    h = jnp.zeros((B, H), jnp.float32)
    c = jnp.zeros((B, H), jnp.float32)

    # Forward direction: fully unrolled static loop (T is a small static trip count),
    # so every access below uses static indices and the scheduler sees the whole chain.
    for t in range(T):
        h, c = lstm_step(xg_ref[t, :, 0:G], h, c, whh_f)
    h_fwd = h

    # Backward direction: the bidirectional output stored at the LAST time index equals
    # the backward cell after a single step on x_{T-1} from a zero state.
    h0 = jnp.zeros((B, H), jnp.float32)
    c0 = jnp.zeros((B, H), jnp.float32)
    h_bwd, _ = lstm_step(xg_ref[T - 1, :, G:2 * G], h0, c0, whh_b)

    # Final linear (no bias): one MXU push on the lane-concatenated (B, 2H) feature.
    feat = jnp.concatenate([h_fwd, h_bwd], axis=1)                         # (B, 2H)
    o_ref[...] = jnp.dot(feat, wlin_ref[...], preferred_element_type=jnp.float32)


# ----------------------------------------------------------------------------
# Wrapper: fold input projection into the embedding table, gather, pallas_call.
# ----------------------------------------------------------------------------
def char_lstm_forward(ids, params, block_b=8):
    # ids: (B, T) int32 character indices in [0, NUM_CHARS]; 0 is padding.
    H, O = HIDDEN_DIM, OUTPUT_DIM
    B, T = ids.shape

    # Fold the input projection + biases into the embedding table (wrapper glue):
    # padding rows of emb are zero, so table row 0 == bias, exactly what the original
    # computes for a padded character (0 @ Wih + b). Shapes: (V, 8H) with 8H = 128.
    wih = jnp.concatenate([params["wih_f"], params["wih_b"]], axis=1)      # (D, 8H)
    bias = jnp.concatenate([params["b_f"], params["b_b"]], axis=1)         # (1, 8H)
    table = params["emb"].astype(jnp.float32) @ wih + bias                 # (V, 8H)

    # Embedding gather + time-major transpose kept as tiny XLA glue.
    # (At non-toy B/T this could move in-kernel via PrefetchScalarGridSpec + SMEM ids.)
    xg = jnp.take(table, ids, axis=0)                                      # (B, T, 8H)
    xg = jnp.transpose(xg, (1, 0, 2))                                      # (T, B, 8H)

    # Tile the batch on a parallel grid axis; pad B up to a multiple of the tile.
    tB = min(block_b, B)
    nb = pl.cdiv(B, tB)
    Bp = nb * tB
    if Bp != B:
        xg = jnp.pad(xg, ((0, 0), (0, Bp - B), (0, 0)))

    G2 = 8 * H
    out = pl.pallas_call(
        char_lstm_kernel,
        out_shape=jax.ShapeDtypeStruct((Bp, O), jnp.float32),
        grid=(nb,),
        in_specs=[
            pl.BlockSpec((T, tB, G2), lambda i: (0, i, 0)),     # per-tile activations
            pl.BlockSpec((H, 4 * H), lambda i: (0, 0)),         # whh_f (resident)
            pl.BlockSpec((H, 4 * H), lambda i: (0, 0)),         # whh_b (resident)
            pl.BlockSpec((2 * H, O), lambda i: (0, 0)),         # wlin  (resident)
        ],
        out_specs=pl.BlockSpec((tB, O), lambda i: (i, 0)),
        compiler_params=pltpu.CompilerParams(dimension_semantics=("parallel",)),
    )(xg, params["whh_f"], params["whh_b"], params["wlin"])
    return out[:B]


# ----------------------------------------------------------------------------
# Pure-JAX reference (mirrors PyTorch nn.LSTM bidirectional semantics).
# ----------------------------------------------------------------------------
def reference_forward(ids, params):
    H = HIDDEN_DIM
    x = params["emb"][ids].astype(jnp.float32)      # (B, T, D)
    x_t = jnp.transpose(x, (1, 0, 2))               # (T, B, D)
    B = x.shape[0]

    def run(wih, whh, b, seq):
        def step(carry, xt):
            h, c = carry
            gates = xt @ wih + h @ whh + b[0]
            i = jax.nn.sigmoid(gates[:, :H])
            f = jax.nn.sigmoid(gates[:, H:2 * H])
            g = jnp.tanh(gates[:, 2 * H:3 * H])
            o = jax.nn.sigmoid(gates[:, 3 * H:])
            c = f * c + i * g
            h = o * jnp.tanh(c)
            return (h, c), h
        init = (jnp.zeros((B, H), jnp.float32), jnp.zeros((B, H), jnp.float32))
        _, hs = lax.scan(step, init, seq)
        return hs                                   # (T, B, H)

    hs_f = run(params["wih_f"], params["whh_f"], params["b_f"], x_t)
    hs_b = run(params["wih_b"], params["whh_b"], params["b_b"], x_t[::-1])
    h_fwd_last = hs_f[-1]                           # forward output at t = T-1
    h_bwd_last = hs_b[0]                            # backward output at t = T-1
    feat = jnp.concatenate([h_fwd_last, h_bwd_last], axis=1)
    return feat @ params["wlin"]


# ----------------------------------------------------------------------------
# Deterministic parameter init (shapes match nn.Embedding/nn.LSTM/nn.Linear).
# ----------------------------------------------------------------------------
def init_params(key):
    D, H, O, V = INPUT_DIM, HIDDEN_DIM, OUTPUT_DIM, NUM_CHARS + 1
    ks = jax.random.split(key, 8)
    s = 0.1
    emb = s * jax.random.normal(ks[0], (V, D), jnp.float32)
    emb = emb.at[0].set(0.0)                        # padding_idx = 0
    return {
        "emb": emb,
        # forward direction (weight_ih_l0.T, weight_hh_l0.T, b_ih + b_hh)
        "wih_f": s * jax.random.normal(ks[1], (D, 4 * H), jnp.float32),
        "whh_f": s * jax.random.normal(ks[2], (H, 4 * H), jnp.float32),
        "b_f":   s * jax.random.normal(ks[3], (1, 4 * H), jnp.float32),
        # reverse direction
        "wih_b": s * jax.random.normal(ks[4], (D, 4 * H), jnp.float32),
        "whh_b": s * jax.random.normal(ks[5], (H, 4 * H), jnp.float32),
        "b_b":   s * jax.random.normal(ks[6], (1, 4 * H), jnp.float32),
        # linear (out_dim, 2H) in torch -> stored transposed (2H, out_dim)
        "wlin":  s * jax.random.normal(ks[7], (2 * H, O), jnp.float32),
    }


if __name__ == "__main__":
    key = jax.random.PRNGKey(0)
    kp, ki = jax.random.split(key)
    params = init_params(kp)

    B, T = 16, 12   # B fills sublanes and exercises the batch-tiled grid (2 tiles of 8)
    ids = jax.random.randint(ki, (B, T), 0, NUM_CHARS + 1, dtype=jnp.int32)

    fwd = jax.jit(char_lstm_forward)
    out = fwd(ids, params)
    out = jax.block_until_ready(out)

    ref = reference_forward(ids, params)
    assert out.shape == (B, OUTPUT_DIM)
    assert jnp.allclose(out, ref, atol=2e-4, rtol=2e-4), (out, ref)

    print("KERNEL_OK")
</pallas_src>

<mosaic_0001>
module attributes {stable_mosaic.version = 11 : i64} {
  func.func @char_lstm_kernel(%arg0: i32, %arg1: memref<12x8x128xf32, #tpu.memory_space<vmem>>, %arg2: memref<16x64xf32, #tpu.memory_space<vmem>>, %arg3: memref<16x64xf32, #tpu.memory_space<vmem>>, %arg4: memref<32x16xf32, #tpu.memory_space<vmem>>, %arg5: memref<8x16xf32, #tpu.memory_space<vmem>>) attributes {dimension_semantics = [#tpu.dimension_semantics<parallel>], iteration_bounds = array<i64: 2>, scalar_prefetch = 0 : i64, scratch_operands = 0 : i64, tpu.core_type = #tpu.core_type<tc>, window_params = [{transform_indices = @transform_0, window_bounds = array<i64: 12, 8, 128>}, {pipeline_mode = #tpu.pipeline_mode<synchronous>, transform_indices = @transform_1, window_bounds = array<i64: 16, 64>}, {pipeline_mode = #tpu.pipeline_mode<synchronous>, transform_indices = @transform_2, window_bounds = array<i64: 16, 64>}, {pipeline_mode = #tpu.pipeline_mode<synchronous>, transform_indices = @transform_3, window_bounds = array<i64: 32, 16>}, {transform_indices = @transform_4, window_bounds = array<i64: 8, 16>}]} {
    %c0 = arith.constant 0 : index
    %c0_0 = arith.constant 0 : index
    %0 = vector.load %arg2[%c0, %c0_0] : memref<16x64xf32, #tpu.memory_space<vmem>>, vector<16x64xf32>
    %c0_1 = arith.constant 0 : index
    %c0_2 = arith.constant 0 : index
    %1 = vector.load %arg3[%c0_1, %c0_2] : memref<16x64xf32, #tpu.memory_space<vmem>>, vector<16x64xf32>
    %cst = arith.constant 0.000000e+00 : f32
    %2 = vector.broadcast %cst : f32 to vector<8x16xf32>
    %cst_3 = arith.constant 0.000000e+00 : f32
    %3 = vector.broadcast %cst_3 : f32 to vector<8x16xf32>
    %c0_4 = arith.constant 0 : index
    %c0_5 = arith.constant 0 : index
    %c0_6 = arith.constant 0 : index
    %4 = vector.load %arg1[%c0_4, %c0_5, %c0_6] : memref<12x8x128xf32, #tpu.memory_space<vmem>>, vector<1x8x64xf32>
    %5 = vector.shape_cast %4 : vector<1x8x64xf32> to vector<8x64xf32>
    %cst_7 = arith.constant dense<0.000000e+00> : vector<8x64xf32>
    %6 = tpu.matmul %2, %0, %cst_7 {dimension_numbers = #tpu.dot_dimension_numbers<[1], [0], [0], [1], [0, 0, 1, 1], [], []>} : vector<8x16xf32>, vector<16x64xf32>, vector<8x64xf32> -> vector<8x64xf32>
    %7 = arith.addf %5, %6 : vector<8x64xf32>
    %8 = arith.negf %7 : vector<8x64xf32>
    %9 = math.exp %8 : vector<8x64xf32>
    %cst_8 = arith.constant 1.000000e+00 : f32
    %10 = vector.broadcast %cst_8 : f32 to vector<8x64xf32>
    %11 = arith.addf %10, %9 : vector<8x64xf32>
    %12 = arith.divf %10, %11 : vector<8x64xf32>
    %13 = math.tanh %7 : vector<8x64xf32>
    %14 = vector.extract_strided_slice %12 {offsets = [0, 0], sizes = [8, 16], strides = [1, 1]} : vector<8x64xf32> to vector<8x16xf32>
    %15 = vector.extract_strided_slice %12 {offsets = [0, 16], sizes = [8, 16], strides = [1, 1]} : vector<8x64xf32> to vector<8x16xf32>
    %16 = vector.extract_strided_slice %13 {offsets = [0, 32], sizes = [8, 16], strides = [1, 1]} : vector<8x64xf32> to vector<8x16xf32>
    %17 = vector.extract_strided_slice %12 {offsets = [0, 48], sizes = [8, 16], strides = [1, 1]} : vector<8x64xf32> to vector<8x16xf32>
    %18 = arith.mulf %15, %3 : vector<8x16xf32>
    %19 = arith.mulf %14, %16 : vector<8x16xf32>
    %20 = arith.addf %18, %19 : vector<8x16xf32>
    %21 = math.tanh %20 : vector<8x16xf32>
    %22 = arith.mulf %17, %21 : vector<8x16xf32>
    %c1 = arith.constant 1 : index
    %c0_9 = arith.constant 0 : index
    %c0_10 = arith.constant 0 : index
    %23 = vector.load %arg1[%c1, %c0_9, %c0_10] : memref<12x8x128xf32, #tpu.memory_space<vmem>>, vector<1x8x64xf32>
    %24 = vector.shape_cast %23 : vector<1x8x64xf32> to vector<8x64xf32>
    %cst_11 = arith.constant dense<0.000000e+00> : vector<8x64xf32>
    %25 = tpu.matmul %22, %0, %cst_11 {dimension_numbers = #tpu.dot_dimension_numbers<[1], [0], [0], [1], [0, 0, 1, 1], [], []>} : vector<8x16xf32>, vector<16x64xf32>, vector<8x64xf32> -> vector<8x64xf32>
    %26 = arith.addf %24, %25 : vector<8x64xf32>
    %27 = arith.negf %26 : vector<8x64xf32>
    %28 = math.exp %27 : vector<8x64xf32>
    %cst_12 = arith.constant 1.000000e+00 : f32
    %29 = vector.broadcast %cst_12 : f32 to vector<8x64xf32>
    %30 = arith.addf %29, %28 : vector<8x64xf32>
    %31 = arith.divf %29, %30 : vector<8x64xf32>
    %32 = math.tanh %26 : vector<8x64xf32>
    %33 = vector.extract_strided_slice %31 {offsets = [0, 0], sizes = [8, 16], strides = [1, 1]} : vector<8x64xf32> to vector<8x16xf32>
    %34 = vector.extract_strided_slice %31 {offsets = [0, 16], sizes = [8, 16], strides = [1, 1]} : vector<8x64xf32> to vector<8x16xf32>
    %35 = vector.extract_strided_slice %32 {offsets = [0, 32], sizes = [8, 16], strides = [1, 1]} : vector<8x64xf32> to vector<8x16xf32>
    %36 = vector.extract_strided_slice %31 {offsets = [0, 48], sizes = [8, 16], strides = [1, 1]} : vector<8x64xf32> to vector<8x16xf32>
    %37 = arith.mulf %34, %20 : vector<8x16xf32>
    %38 = arith.mulf %33, %35 : vector<8x16xf32>
    %39 = arith.addf %37, %38 : vector<8x16xf32>
    %40 = math.tanh %39 : vector<8x16xf32>
    %41 = arith.mulf %36, %40 : vector<8x16xf32>
    %c2 = arith.constant 2 : index
    %c0_13 = arith.constant 0 : index
    %c0_14 = arith.constant 0 : index
    %42 = vector.load %arg1[%c2, %c0_13, %c0_14] : memref<12x8x128xf32, #tpu.memory_space<vmem>>, vector<1x8x64xf32>
    %43 = vector.shape_cast %42 : vector<1x8x64xf32> to vector<8x64xf32>
    %cst_15 = arith.constant dense<0.000000e+00> : vector<8x64xf32>
    %44 = tpu.matmul %41, %0, %cst_15 {dimension_numbers = #tpu.dot_dimension_numbers<[1], [0], [0], [1], [0, 0, 1, 1], [], []>} : vector<8x16xf32>, vector<16x64xf32>, vector<8x64xf32> -> vector<8x64xf32>
    %45 = arith.addf %43, %44 : vector<8x64xf32>
    %46 = arith.negf %45 : vector<8x64xf32>
    %47 = math.exp %46 : vector<8x64xf32>
    %cst_16 = arith.constant 1.000000e+00 : f32
    %48 = vector.broadcast %cst_16 : f32 to vector<8x64xf32>
    %49 = arith.addf %48, %47 : vector<8x64xf32>
    %50 = arith.divf %48, %49 : vector<8x64xf32>
    %51 = math.tanh %45 : vector<8x64xf32>
    %52 = vector.extract_strided_slice %50 {offsets = [0, 0], sizes = [8, 16], strides = [1, 1]} : vector<8x64xf32> to vector<8x16xf32>
    %53 = vector.extract_strided_slice %50 {offsets = [0, 16], sizes = [8, 16], strides = [1, 1]} : vector<8x64xf32> to vector<8x16xf32>
    %54 = vector.extract_strided_slice %51 {offsets = [0, 32], sizes = [8, 16], strides = [1, 1]} : vector<8x64xf32> to vector<8x16xf32>
    %55 = vector.extract_strided_slice %50 {offsets = [0, 48], sizes = [8, 16], strides = [1, 1]} : vector<8x64xf32> to vector<8x16xf32>
    %56 = arith.mulf %53, %39 : vector<8x16xf32>
    %57 = arith.mulf %52, %54 : vector<8x16xf32>
    %58 = arith.addf %56, %57 : vector<8x16xf32>
    %59 = math.tanh %58 : vector<8x16xf32>
    %60 = arith.mulf %55, %59 : vector<8x16xf32>
    %c3 = arith.constant 3 : index
    %c0_17 = arith.constant 0 : index
    %c0_18 = arith.constant 0 : index
    %61 = vector.load %arg1[%c3, %c0_17, %c0_18] : memref<12x8x128xf32, #tpu.memory_space<vmem>>, vector<1x8x64xf32>
    %62 = vector.shape_cast %61 : vector<1x8x64xf32> to vector<8x64xf32>
    %cst_19 = arith.constant dense<0.000000e+00> : vector<8x64xf32>
    %63 = tpu.matmul %60, %0, %cst_19 {dimension_numbers = #tpu.dot_dimension_numbers<[1], [0], [0], [1], [0, 0, 1, 1], [], []>} : vector<8x16xf32>, vector<16x64xf32>, vector<8x64xf32> -> vector<8x64xf32>
    %64 = arith.addf %62, %63 : vector<8x64xf32>
    %65 = arith.negf %64 : vector<8x64xf32>
    %66 = math.exp %65 : vector<8x64xf32>
    %cst_20 = arith.constant 1.000000e+00 : f32
    %67 = vector.broadcast %cst_20 : f32 to vector<8x64xf32>
    %68 = arith.addf %67, %66 : vector<8x64xf32>
    %69 = arith.divf %67, %68 : vector<8x64xf32>
    %70 = math.tanh %64 : vector<8x64xf32>
    %71 = vector.extract_strided_slice %69 {offsets = [0, 0], sizes = [8, 16], strides = [1, 1]} : vector<8x64xf32> to vector<8x16xf32>
    %72 = vector.extract_strided_slice %69 {offsets = [0, 16], sizes = [8, 16], strides = [1, 1]} : vector<8x64xf32> to vector<8x16xf32>
    %73 = vector.extract_strided_slice %70 {offsets = [0, 32], sizes = [8, 16], strides = [1, 1]} : vector<8x64xf32> to vector<8x16xf32>
    %74 = vector.extract_strided_slice %69 {offsets = [0, 48], sizes = [8, 16], strides = [1, 1]} : vector<8x64xf32> to vector<8x16xf32>
    %75 = arith.mulf %72, %58 : vector<8x16xf32>
    %76 = arith.mulf %71, %73 : vector<8x16xf32>
    %77 = arith.addf %75, %76 : vector<8x16xf32>
    %78 = math.tanh %77 : vector<8x16xf32>
    %79 = arith.mulf %74, %78 : vector<8x16xf32>
    %c4 = arith.constant 4 : index
    %c0_21 = arith.constant 0 : index
    %c0_22 = arith.constant 0 : index
    %80 = vector.load %arg1[%c4, %c0_21, %c0_22] : memref<12x8x128xf32, #tpu.memory_space<vmem>>, vector<1x8x64xf32>
    %81 = vector.shape_cast %80 : vector<1x8x64xf32> to vector<8x64xf32>
    %cst_23 = arith.constant dense<0.000000e+00> : vector<8x64xf32>
    %82 = tpu.matmul %79, %0, %cst_23 {dimension_numbers = #tpu.dot_dimension_numbers<[1], [0], [0], [1], [0, 0, 1, 1], [], []>} : vector<8x16xf32>, vector<16x64xf32>, vector<8x64xf32> -> vector<8x64xf32>
    %83 = arith.addf %81, %82 : vector<8x64xf32>
    %84 = arith.negf %83 : vector<8x64xf32>
    %85 = math.exp %84 : vector<8x64xf32>
    %cst_24 = arith.constant 1.000000e+00 : f32
    %86 = vector.broadcast %cst_24 : f32 to vector<8x64xf32>
    %87 = arith.addf %86, %85 : vector<8x64xf32>
    %88 = arith.divf %86, %87 : vector<8x64xf32>
    %89 = math.tanh %83 : vector<8x64xf32>
    %90 = vector.extract_strided_slice %88 {offsets = [0, 0], sizes = [8, 16], strides = [1, 1]} : vector<8x64xf32> to vector<8x16xf32>
    %91 = vector.extract_strided_slice %88 {offsets = [0, 16], sizes = [8, 16], strides = [1, 1]} : vector<8x64xf32> to vector<8x16xf32>
    %92 = vector.extract_strided_slice %89 {offsets = [0, 32], sizes = [8, 16], strides = [1, 1]} : vector<8x64xf32> to vector<8x16xf32>
    %93 = vector.extract_strided_slice %88 {offsets = [0, 48], sizes = [8, 16], strides = [1, 1]} : vector<8x64xf32> to vector<8x16xf32>
    %94 = arith.mulf %91, %77 : vector<8x16xf32>
    %95 = arith.mulf %90, %92 : vector<8x16xf32>
    %96 = arith.addf %94, %95 : vector<8x16xf32>
    %97 = math.tanh %96 : vector<8x16xf32>
    %98 = arith.mulf %93, %97 : vector<8x16xf32>
    %c5 = arith.constant 5 : index
    %c0_25 = arith.constant 0 : index
    %c0_26 = arith.constant 0 : index
    %99 = vector.load %arg1[%c5, %c0_25, %c0_26] : memref<12x8x128xf32, #tpu.memory_space<vmem>>, vector<1x8x64xf32>
    %100 = vector.shape_cast %99 : vector<1x8x64xf32> to vector<8x64xf32>
    %cst_27 = arith.constant dense<0.000000e+00> : vector<8x64xf32>
    %101 = tpu.matmul %98, %0, %cst_27 {dimension_numbers = #tpu.dot_dimension_numbers<[1], [0], [0], [1], [0, 0, 1, 1], [], []>} : vector<8x16xf32>, vector<16x64xf32>, vector<8x64xf32> -> vector<8x64xf32>
    %102 = arith.addf %100, %101 : vector<8x64xf32>
    %103 = arith.negf %102 : vector<8x64xf32>
    %104 = math.exp %103 : vector<8x64xf32>
    %cst_28 = arith.constant 1.000000e+00 : f32
    %105 = vector.broadcast %cst_28 : f32 to vector<8x64xf32>
    %106 = arith.addf %105, %104 : vector<8x64xf32>
    %107 = arith.divf %105, %106 : vector<8x64xf32>
    %108 = math.tanh %102 : vector<8x64xf32>
    %109 = vector.extract_strided_slice %107 {offsets = [0, 0], sizes = [8, 16], strides = [1, 1]} : vector<8x64xf32> to vector<8x16xf32>
    %110 = vector.extract_strided_slice %107 {offsets = [0, 16], sizes = [8, 16], strides = [1, 1]} : vector<8x64xf32> to vector<8x16xf32>
    %111 = vector.extract_strided_slice %108 {offsets = [0, 32], sizes = [8, 16], strides = [1, 1]} : vector<8x64xf32> to vector<8x16xf32>
    %112 = vector.extract_strided_slice %107 {offsets = [0, 48], sizes = [8, 16], strides = [1, 1]} : vector<8x64xf32> to vector<8x16xf32>
    %113 = arith.mulf %110, %96 : vector<8x16xf32>
    %114 = arith.mulf %109, %111 : vector<8x16xf32>
    %115 = arith.addf %113, %114 : vector<8x16xf32>
    %116 = math.tanh %115 : vector<8x16xf32>
    %117 = arith.mulf %112, %116 : vector<8x16xf32>
    %c6 = arith.constant 6 : index
    %c0_29 = arith.constant 0 : index
    %c0_30 = arith.constant 0 : index
    %118 = vector.load %arg1[%c6, %c0_29, %c0_30] : memref<12x8x128xf32, #tpu.memory_space<vmem>>, vector<1x8x64xf32>
    %119 = vector.shape_cast %118 : vector<1x8x64xf32> to vector<8x64xf32>
    %cst_31 = arith.constant dense<0.000000e+00> : vector<8x64xf32>
    %120 = tpu.matmul %117, %0, %cst_31 {dimension_numbers = #tpu.dot_dimension_numbers<[1], [0], [0], [1], [0, 0, 1, 1], [], []>} : vector<8x16xf32>, vector<16x64xf32>, vector<8x64xf32> -> vector<8x64xf32>
    %121 = arith.addf %119, %120 : vector<8x64xf32>
    %122 = arith.negf %121 : vector<8x64xf32>
    %123 = math.exp %122 : vector<8x64xf32>
    %cst_32 = arith.constant 1.000000e+00 : f32
    %124 = vector.broadcast %cst_32 : f32 to vector<8x64xf32>
    %125 = arith.addf %124, %123 : vector<8x64xf32>
    %126 = arith.divf %124, %125 : vector<8x64xf32>
    %127 = math.tanh %121 : vector<8x64xf32>
    %128 = vector.extract_strided_slice %126 {offsets = [0, 0], sizes = [8, 16], strides = [1, 1]} : vector<8x64xf32> to vector<8x16xf32>
    %129 = vector.extract_strided_slice %126 {offsets = [0, 16], sizes = [8, 16], strides = [1, 1]} : vector<8x64xf32> to vector<8x16xf32>
    %130 = vector.extract_strided_slice %127 {offsets = [0, 32], sizes = [8, 16], strides = [1, 1]} : vector<8x64xf32> to vector<8x16xf32>
    %131 = vector.extract_strided_slice %126 {offsets = [0, 48], sizes = [8, 16], strides = [1, 1]} : vector<8x64xf32> to vector<8x16xf32>
    %132 = arith.mulf %129, %115 : vector<8x16xf32>
    %133 = arith.mulf %128, %130 : vector<8x16xf32>
    %134 = arith.addf %132, %133 : vector<8x16xf32>
    %135 = math.tanh %134 : vector<8x16xf32>
    %136 = arith.mulf %131, %135 : vector<8x16xf32>
    %c7 = arith.constant 7 : index
    %c0_33 = arith.constant 0 : index
    %c0_34 = arith.constant 0 : index
    %137 = vector.load %arg1[%c7, %c0_33, %c0_34] : memref<12x8x128xf32, #tpu.memory_space<vmem>>, vector<1x8x64xf32>
    %138 = vector.shape_cast %137 : vector<1x8x64xf32> to vector<8x64xf32>
    %cst_35 = arith.constant dense<0.000000e+00> : vector<8x64xf32>
    %139 = tpu.matmul %136, %0, %cst_35 {dimension_numbers = #tpu.dot_dimension_numbers<[1], [0], [0], [1], [0, 0, 1, 1], [], []>} : vector<8x16xf32>, vector<16x64xf32>, vector<8x64xf32> -> vector<8x64xf32>
    %140 = arith.addf %138, %139 : vector<8x64xf32>
    %141 = arith.negf %140 : vector<8x64xf32>
    %142 = math.exp %141 : vector<8x64xf32>
    %cst_36 = arith.constant 1.000000e+00 : f32
    %143 = vector.broadcast %cst_36 : f32 to vector<8x64xf32>
    %144 = arith.addf %143, %142 : vector<8x64xf32>
    %145 = arith.divf %143, %144 : vector<8x64xf32>
    %146 = math.tanh %140 : vector<8x64xf32>
    %147 = vector.extract_strided_slice %145 {offsets = [0, 0], sizes = [8, 16], strides = [1, 1]} : vector<8x64xf32> to vector<8x16xf32>
    %148 = vector.extract_strided_slice %145 {offsets = [0, 16], sizes = [8, 16], strides = [1, 1]} : vector<8x64xf32> to vector<8x16xf32>
    %149 = vector.extract_strided_slice %146 {offsets = [0, 32], sizes = [8, 16], strides = [1, 1]} : vector<8x64xf32> to vector<8x16xf32>
    %150 = vector.extract_strided_slice %145 {offsets = [0, 48], sizes = [8, 16], strides = [1, 1]} : vector<8x64xf32> to vector<8x16xf32>
    %151 = arith.mulf %148, %134 : vector<8x16xf32>
    %152 = arith.mulf %147, %149 : vector<8x16xf32>
    %153 = arith.addf %151, %152 : vector<8x16xf32>
    %154 = math.tanh %153 : vector<8x16xf32>
    %155 = arith.mulf %150, %154 : vector<8x16xf32>
    %c8 = arith.constant 8 : index
    %c0_37 = arith.constant 0 : index
    %c0_38 = arith.constant 0 : index
    %156 = vector.load %arg1[%c8, %c0_37, %c0_38] : memref<12x8x128xf32, #tpu.memory_space<vmem>>, vector<1x8x64xf32>
    %157 = vector.shape_cast %156 : vector<1x8x64xf32> to vector<8x64xf32>
    %cst_39 = arith.constant dense<0.000000e+00> : vector<8x64xf32>
    %158 = tpu.matmul %155, %0, %cst_39 {dimension_numbers = #tpu.dot_dimension_numbers<[1], [0], [0], [1], [0, 0, 1, 1], [], []>} : vector<8x16xf32>, vector<16x64xf32>, vector<8x64xf32> -> vector<8x64xf32>
    %159 = arith.addf %157, %158 : vector<8x64xf32>
    %160 = arith.negf %159 : vector<8x64xf32>
    %161 = math.exp %160 : vector<8x64xf32>
    %cst_40 = arith.constant 1.000000e+00 : f32
    %162 = vector.broadcast %cst_40 : f32 to vector<8x64xf32>
    %163 = arith.addf %162, %161 : vector<8x64xf32>
    %164 = arith.divf %162, %163 : vector<8x64xf32>
    %165 = math.tanh %159 : vector<8x64xf32>
    %166 = vector.extract_strided_slice %164 {offsets = [0, 0], sizes = [8, 16], strides = [1, 1]} : vector<8x64xf32> to vector<8x16xf32>
    %167 = vector.extract_strided_slice %164 {offsets = [0, 16], sizes = [8, 16], strides = [1, 1]} : vector<8x64xf32> to vector<8x16xf32>
    %168 = vector.extract_strided_slice %165 {offsets = [0, 32], sizes = [8, 16], strides = [1, 1]} : vector<8x64xf32> to vector<8x16xf32>
    %169 = vector.extract_strided_slice %164 {offsets = [0, 48], sizes = [8, 16], strides = [1, 1]} : vector<8x64xf32> to vector<8x16xf32>
    %170 = arith.mulf %167, %153 : vector<8x16xf32>
    %171 = arith.mulf %166, %168 : vector<8x16xf32>
    %172 = arith.addf %170, %171 : vector<8x16xf32>
    %173 = math.tanh %172 : vector<8x16xf32>
    %174 = arith.mulf %169, %173 : vector<8x16xf32>
    %c9 = arith.constant 9 : index
    %c0_41 = arith.constant 0 : index
    %c0_42 = arith.constant 0 : index
    %175 = vector.load %arg1[%c9, %c0_41, %c0_42] : memref<12x8x128xf32, #tpu.memory_space<vmem>>, vector<1x8x64xf32>
    %176 = vector.shape_cast %175 : vector<1x8x64xf32> to vector<8x64xf32>
    %cst_43 = arith.constant dense<0.000000e+00> : vector<8x64xf32>
    %177 = tpu.matmul %174, %0, %cst_43 {dimension_numbers = #tpu.dot_dimension_numbers<[1], [0], [0], [1], [0, 0, 1, 1], [], []>} : vector<8x16xf32>, vector<16x64xf32>, vector<8x64xf32> -> vector<8x64xf32>
    %178 = arith.addf %176, %177 : vector<8x64xf32>
    %179 = arith.negf %178 : vector<8x64xf32>
    %180 = math.exp %179 : vector<8x64xf32>
    %cst_44 = arith.constant 1.000000e+00 : f32
    %181 = vector.broadcast %cst_44 : f32 to vector<8x64xf32>
    %182 = arith.addf %181, %180 : vector<8x64xf32>
    %183 = arith.divf %181, %182 : vector<8x64xf32>
    %184 = math.tanh %178 : vector<8x64xf32>
    %185 = vector.extract_strided_slice %183 {offsets = [0, 0], sizes = [8, 16], strides = [1, 1]} : vector<8x64xf32> to vector<8x16xf32>
    %186 = vector.extract_strided_slice %183 {offsets = [0, 16], sizes = [8, 16], strides = [1, 1]} : vector<8x64xf32> to vector<8x16xf32>
    %187 = vector.extract_strided_slice %184 {offsets = [0, 32], sizes = [8, 16], strides = [1, 1]} : vector<8x64xf32> to vector<8x16xf32>
    %188 = vector.extract_strided_slice %183 {offsets = [0, 48], sizes = [8, 16], strides = [1, 1]} : vector<8x64xf32> to vector<8x16xf32>
    %189 = arith.mulf %186, %172 : vector<8x16xf32>
    %190 = arith.mulf %185, %187 : vector<8x16xf32>
    %191 = arith.addf %189, %190 : vector<8x16xf32>
    %192 = math.tanh %191 : vector<8x16xf32>
    %193 = arith.mulf %188, %192 : vector<8x16xf32>
    %c10 = arith.constant 10 : index
    %c0_45 = arith.constant 0 : index
    %c0_46 = arith.constant 0 : index
    %194 = vector.load %arg1[%c10, %c0_45, %c0_46] : memref<12x8x128xf32, #tpu.memory_space<vmem>>, vector<1x8x64xf32>
    %195 = vector.shape_cast %194 : vector<1x8x64xf32> to vector<8x64xf32>
    %cst_47 = arith.constant dense<0.000000e+00> : vector<8x64xf32>
    %196 = tpu.matmul %193, %0, %cst_47 {dimension_numbers = #tpu.dot_dimension_numbers<[1], [0], [0], [1], [0, 0, 1, 1], [], []>} : vector<8x16xf32>, vector<16x64xf32>, vector<8x64xf32> -> vector<8x64xf32>
    %197 = arith.addf %195, %196 : vector<8x64xf32>
    %198 = arith.negf %197 : vector<8x64xf32>
    %199 = math.exp %198 : vector<8x64xf32>
    %cst_48 = arith.constant 1.000000e+00 : f32
    %200 = vector.broadcast %cst_48 : f32 to vector<8x64xf32>
    %201 = arith.addf %200, %199 : vector<8x64xf32>
    %202 = arith.divf %200, %201 : vector<8x64xf32>
    %203 = math.tanh %197 : vector<8x64xf32>
    %204 = vector.extract_strided_slice %202 {offsets = [0, 0], sizes = [8, 16], strides = [1, 1]} : vector<8x64xf32> to vector<8x16xf32>
    %205 = vector.extract_strided_slice %202 {offsets = [0, 16], sizes = [8, 16], strides = [1, 1]} : vector<8x64xf32> to vector<8x16xf32>
    %206 = vector.extract_strided_slice %203 {offsets = [0, 32], sizes = [8, 16], strides = [1, 1]} : vector<8x64xf32> to vector<8x16xf32>
    %207 = vector.extract_strided_slice %202 {offsets = [0, 48], sizes = [8, 16], strides = [1, 1]} : vector<8x64xf32> to vector<8x16xf32>
    %208 = arith.mulf %205, %191 : vector<8x16xf32>
    %209 = arith.mulf %204, %206 : vector<8x16xf32>
    %210 = arith.addf %208, %209 : vector<8x16xf32>
    %211 = math.tanh %210 : vector<8x16xf32>
    %212 = arith.mulf %207, %211 : vector<8x16xf32>
    %c11 = arith.constant 11 : index
    %c0_49 = arith.constant 0 : index
    %c0_50 = arith.constant 0 : index
    %213 = vector.load %arg1[%c11, %c0_49, %c0_50] : memref<12x8x128xf32, #tpu.memory_space<vmem>>, vector<1x8x64xf32>
    %214 = vector.shape_cast %213 : vector<1x8x64xf32> to vector<8x64xf32>
    %cst_51 = arith.constant dense<0.000000e+00> : vector<8x64xf32>
    %215 = tpu.matmul %212, %0, %cst_51 {dimension_numbers = #tpu.dot_dimension_numbers<[1], [0], [0], [1], [0, 0, 1, 1], [], []>} : vector<8x16xf32>, vector<16x64xf32>, vector<8x64xf32> -> vector<8x64xf32>
    %216 = arith.addf %214, %215 : vector<8x64xf32>
    %217 = arith.negf %216 : vector<8x64xf32>
    %218 = math.exp %217 : vector<8x64xf32>
    %cst_52 = arith.constant 1.000000e+00 : f32
    %219 = vector.broadcast %cst_52 : f32 to vector<8x64xf32>
    %220 = arith.addf %219, %218 : vector<8x64xf32>
    %221 = arith.divf %219, %220 : vector<8x64xf32>
    %222 = math.tanh %216 : vector<8x64xf32>
    %223 = vector.extract_strided_slice %221 {offsets = [0, 0], sizes = [8, 16], strides = [1, 1]} : vector<8x64xf32> to vector<8x16xf32>
    %224 = vector.extract_strided_slice %221 {offsets = [0, 16], sizes = [8, 16], strides = [1, 1]} : vector<8x64xf32> to vector<8x16xf32>
    %225 = vector.extract_strided_slice %222 {offsets = [0, 32], sizes = [8, 16], strides = [1, 1]} : vector<8x64xf32> to vector<8x16xf32>
    %226 = vector.extract_strided_slice %221 {offsets = [0, 48], sizes = [8, 16], strides = [1, 1]} : vector<8x64xf32> to vector<8x16xf32>
    %227 = arith.mulf %224, %210 : vector<8x16xf32>
    %228 = arith.mulf %223, %225 : vector<8x16xf32>
    %229 = arith.addf %227, %228 : vector<8x16xf32>
    %230 = math.tanh %229 : vector<8x16xf32>
    %231 = arith.mulf %226, %230 : vector<8x16xf32>
    %cst_53 = arith.constant 0.000000e+00 : f32
    %232 = vector.broadcast %cst_53 : f32 to vector<8x16xf32>
    %cst_54 = arith.constant 0.000000e+00 : f32
    %233 = vector.broadcast %cst_54 : f32 to vector<8x16xf32>
    %c11_55 = arith.constant 11 : index
    %c0_56 = arith.constant 0 : index
    %c64 = arith.constant 64 : index
    %234 = vector.load %arg1[%c11_55, %c0_56, %c64] : memref<12x8x128xf32, #tpu.memory_space<vmem>>, vector<1x8x64xf32>
    %235 = vector.shape_cast %234 : vector<1x8x64xf32> to vector<8x64xf32>
    %cst_57 = arith.constant dense<0.000000e+00> : vector<8x64xf32>
    %236 = tpu.matmul %232, %1, %cst_57 {dimension_numbers = #tpu.dot_dimension_numbers<[1], [0], [0], [1], [0, 0, 1, 1], [], []>} : vector<8x16xf32>, vector<16x64xf32>, vector<8x64xf32> -> vector<8x64xf32>
    %237 = arith.addf %235, %236 : vector<8x64xf32>
    %238 = arith.negf %237 : vector<8x64xf32>
    %239 = math.exp %238 : vector<8x64xf32>
    %cst_58 = arith.constant 1.000000e+00 : f32
    %240 = vector.broadcast %cst_58 : f32 to vector<8x64xf32>
    %241 = arith.addf %240, %239 : vector<8x64xf32>
    %242 = arith.divf %240, %241 : vector<8x64xf32>
    %243 = math.tanh %237 : vector<8x64xf32>
    %244 = vector.extract_strided_slice %242 {offsets = [0, 0], sizes = [8, 16], strides = [1, 1]} : vector<8x64xf32> to vector<8x16xf32>
    %245 = vector.extract_strided_slice %242 {offsets = [0, 16], sizes = [8, 16], strides = [1, 1]} : vector<8x64xf32> to vector<8x16xf32>
    %246 = vector.extract_strided_slice %243 {offsets = [0, 32], sizes = [8, 16], strides = [1, 1]} : vector<8x64xf32> to vector<8x16xf32>
    %247 = vector.extract_strided_slice %242 {offsets = [0, 48], sizes = [8, 16], strides = [1, 1]} : vector<8x64xf32> to vector<8x16xf32>
    %248 = arith.mulf %245, %233 : vector<8x16xf32>
    %249 = arith.mulf %244, %246 : vector<8x16xf32>
    %250 = arith.addf %248, %249 : vector<8x16xf32>
    %251 = math.tanh %250 : vector<8x16xf32>
    %252 = arith.mulf %247, %251 : vector<8x16xf32>
    %253 = tpu.concatenate %231, %252 in 1 : vector<8x16xf32>, vector<8x16xf32> -> vector<8x32xf32>
    %c0_59 = arith.constant 0 : index
    %c0_60 = arith.constant 0 : index
    %254 = vector.load %arg4[%c0_59, %c0_60] : memref<32x16xf32, #tpu.memory_space<vmem>>, vector<32x16xf32>
    %cst_61 = arith.constant dense<0.000000e+00> : vector<8x16xf32>
    %255 = tpu.matmul %253, %254, %cst_61 {dimension_numbers = #tpu.dot_dimension_numbers<[1], [0], [0], [1], [0, 0, 1, 1], [], []>} : vector<8x32xf32>, vector<32x16xf32>, vector<8x16xf32> -> vector<8x16xf32>
    %c0_62 = arith.constant 0 : index
    %c0_63 = arith.constant 0 : index
    %256 = vector.load %arg5[%c0_62, %c0_63] : memref<8x16xf32, #tpu.memory_space<vmem>>, vector<8x16xf32>
    tpu.vector_store %arg5[%c0_62, %c0_63], %255 {strides = array<i32>} : memref<8x16xf32, #tpu.memory_space<vmem>>, vector<8x16xf32>,
    return
  }
  func.func @transform_0(%arg0: i32) -> (i32, i32, i32) {
    %c0_i32 = arith.constant 0 : i32
    %c0_i32_0 = arith.constant 0 : i32
    %c0_i32_1 = arith.constant 0 : i32
    return %c0_i32, %arg0, %c0_i32_0 : i32, i32, i32
  }
  func.func @transform_1(%arg0: i32) -> (i32, i32) {
    %c0_i32 = arith.constant 0 : i32
    %c0_i32_0 = arith.constant 0 : i32
    %c0_i32_1 = arith.constant 0 : i32
    return %c0_i32, %c0_i32_0 : i32, i32
  }
  func.func @transform_2(%arg0: i32) -> (i32, i32) {
    %c0_i32 = arith.constant 0 : i32
    %c0_i32_0 = arith.constant 0 : i32
    %c0_i32_1 = arith.constant 0 : i32
    return %c0_i32, %c0_i32_0 : i32, i32
  }
  func.func @transform_3(%arg0: i32) -> (i32, i32) {
    %c0_i32 = arith.constant 0 : i32
    %c0_i32_0 = arith.constant 0 : i32
    %c0_i32_1 = arith.constant 0 : i32
    return %c0_i32, %c0_i32_0 : i32, i32
  }
  func.func @transform_4(%arg0: i32) -> (i32, i32) {
    %c0_i32 = arith.constant 0 : i32
    %c0_i32_0 = arith.constant 0 : i32
    return %arg0, %c0_i32 : i32, i32
  }
}

</mosaic_0001>

<bundles_post_ra>
// kernel: char_lstm_forward.1
= control target key start
LH: loop header
LB: loop body
LE: loop exit
PB: predicated region body
PF: predicated region fallthrough
CT: control target
= control target key end

     0   :  { %9 = vsyncpa [#allocation4], 0  ;;  %s2526_s0 = inlined_call_operand.vmem [shape: f32[12,16,128], index: 0, kind: input, shape index: {}]   ;;  %s2527_s1 = inlined_call_operand.vmem [shape: f32[16,64], index: 1, kind: input, shape index: {}]   ;;  %s2528_s2 = inlined_call_operand.vmem [shape: f32[16,64], index: 2, kind: input, shape index: {}]   ;;  %s2529_s3 = inlined_call_operand.vmem [shape: f32[32,16], index: 3, kind: input, shape index: {}]   ;;  %s2530_s4 = inlined_call_operand.hbm [shape: f32[16,16], index: 4, kind: output, shape index: {}]  }
   0x1   :  { %11 = vsyncpa [#allocation4 + $0x1], 0  ;;  %s2254_s15 = smov 0   ;;  %s2256_s16 = smov 0  }
   0x2   :  { %s2258_s17 = smov 0   ;;  %s2260_s18 = smov 0  }
   0x3 LB: > { %s1765_s19 = sadd.s32 4294967295, %s2218_s18   ;;  %s1766_s20 = sadd.s32 4294967294, %s2218_s18   ;;  %s2218_s18 = sphi %s2260_s18, %s2536_s18   ;;  %s2214_s17 = sphi %s2258_s17, %s2535_s17   ;;  %s2210_s16 = sphi %s2256_s16, %s2534_s16   ;;  %s2206_s15 = sphi %s2254_s15, %s2533_s15  }
   0x4   : > { %s2277_s21 = sadd.s32 1, %s2218_s18   ;;  %s24_s22 = sadd.s32 1, %s2214_s17 }
   0x5   : > { %s21_s23 = ssub.s32 %s2218_s18, %s2277_s21  ;;  %p31_p0 = scmp.ne.s32.totalorder %s2214_s17, %s2210_s16 }
   0x6   : > { %p22_p1 = scmp.eq.s32.totalorder %s21_s23, 0  ;;  %p32_p2 = scmp.eq.s32.totalorder %s2218_s18, 0 }
   0x7   : > { %p124_p3 = scmp.eq.s32.totalorder %s1765_s19, 1  ;;  %p129_p4 = scmp.ne.s32.totalorder %s2210_s16, %s2206_s15 }
   0x8   : > { %s2290_s24 = scalar_select %p22_p1, %s2214_s17, %s24_s22  }
   0x9   : > { %p33_p5 = por %p32_p2, %p31_p0  ;;  %p2292_p6 = por %p124_p3, %p31_p0 }
   0xa   : > { %p130_p7 = scmp.eq.s32.totalorder %s1766_s20, 1  ;;  %p1768_p9 = scmp.ge.s32.totalorder %s2218_s18, 2 }
   0xc   : > { %p2296_p8 = por %p130_p7, %p129_p4  ;;  %155 = sbr.rel (%p1768_p9) target bundleno = 29 (0x1d), region = 28 }
  0x13   : > { %158 = sbr.rel (!%p33_p5) target bundleno = 29 (0x1d), region = 32  ;;  %s160_s27 = sand.u32 (%p33_p5), 1, %s2214_s17  }
  0x14   : > { %s1769_s28 = sshll.u32 (%p33_p5), %s2218_s18, 3  ;;  %s2003_s29 = smul.u32 (%p33_p5), 96, %s160_s27 }
  0x15   : > { %s164_s6 = scalar_lea.vmem (%p33_p5), %s2526_s0, %s1769_s28 }
  0x16   : > { %v214_v0 = vld [vmem:[%s164_s6] sm:$0xff] (%p33_p5)  ;;  %v216_v1 = vld [vmem:[%s164_s6 + $0x10] sm:$0xff] (%p33_p5)  ;;  %s162_s7 = scalar_lea.vmem (%p33_p5), [#allocation2], %s2003_s29 }
  0x17   : > { %v218_v2 = vld [vmem:[%s164_s6 + $0x20] sm:$0xff] (%p33_p5)  ;;  %v220_v3 = vld [vmem:[%s164_s6 + $0x30] sm:$0xff] (%p33_p5)  ;;  %215 = vst [vmem:[%s162_s7] sm:$0xff] (%p33_p5), %v214_v0  ;;  %217 = vst [vmem:[%s162_s7 + $0x8] sm:$0xff] (%p33_p5), %v216_v1 }
  0x18   : > { %v222_v4 = vld [vmem:[%s164_s6 + $0x40] sm:$0xff] (%p33_p5)  ;;  %v224_v5 = vld [vmem:[%s164_s6 + $0x50] sm:$0xff] (%p33_p5)  ;;  %219 = vst [vmem:[%s162_s7 + $0x10] sm:$0xff] (%p33_p5), %v218_v2  ;;  %221 = vst [vmem:[%s162_s7 + $0x18] sm:$0xff] (%p33_p5), %v220_v3 }
  0x19   : > { %223 = vst [vmem:[%s162_s7 + $0x20] sm:$0xff] (%p33_p5), %v222_v4  ;;  %225 = vst [vmem:[%s162_s7 + $0x28] sm:$0xff] (%p33_p5), %v224_v5  ;;  %v226_v6 = vld [vmem:[%s164_s6 + $0x60] sm:$0xff] (%p33_p5)  ;;  %v228_v7 = vld [vmem:[%s164_s6 + $0x70] sm:$0xff] (%p33_p5) }
  0x1a   : > { %v230_v8 = vld [vmem:[%s164_s6 + $0x80] sm:$0xff]  ;;  %227 = vst [vmem:[%s162_s7 + $0x30] sm:$0xff] %v226_v6  ;;  %229 = vst [vmem:[%s162_s7 + $0x38] sm:$0xff] %v228_v7  ;;  %v232_v9 = vld [vmem:[%s164_s6 + $0x90] sm:$0xff] }
  0x1b   : > { %231 = vst [vmem:[%s162_s7 + $0x40] sm:$0xff] %v230_v8  ;;  %v234_v10 = vld [vmem:[%s164_s6 + $0xa0] sm:$0xff]  ;;  %v236_v11 = vld [vmem:[%s164_s6 + $0xb0] sm:$0xff]  ;;  %233 = vst [vmem:[%s162_s7 + $0x48] sm:$0xff] %v232_v9 }
  0x1c   : > { %235 = vst [vmem:[%s162_s7 + $0x50] sm:$0xff] %v234_v10  ;;  %237 = vst [vmem:[%s162_s7 + $0x58] sm:$0xff] %v236_v11 }
  0x1d PF: > { %p1770_p10 = scmp.ge.s32.totalorder %s2218_s18, 1  ;;  %p242_p11 = scmp.lt.s32.totalorder %s2218_s18, 3 }
  0x1f   : > { %p243_p12 = pnand %p1770_p10, %p242_p11 }
  0x20   : > { %v274_v12 = vld [vmem:[%s2527_s1] sm:$0xff] (!%p243_p12)  ;;  %v275_v13 = vld [vmem:[%s2527_s1 + $0x8] sm:$0xff] (!%p243_p12)  ;;  %v2220_v14 = vmov (!%p243_p12), 0.0|0.0   ;;  %vm2221_vm0 = vmmov (!%p243_p12), 0   ;;  %v2222_v16 = vmov (!%p243_p12), 0.0   ;;  %s2334_s12 = sand.u32 (!%p243_p12), 1, %s2210_s16  }
  0x21   : > { %246 = sbr.rel (%p243_p12) target bundleno = 8689 (0x21f1), region = 70  ;;  %1958 = vmatprep.subr.bf16.mxu0 (!%p243_p12), %v2220_v14  ;;  %v2317_v15 = vpack.c.bf16 (!%p243_p12), %v275_v13, %v274_v12  ;;  %1860 = vmatprep.mubr.msk.f32.mxu0 (!%p243_p12), %vm2221_vm0, %v2222_v16  ;;  %s2223_s20 = smov (!%p243_p12), 96   ;;  %vm279_vm1 = vcmask (!%p243_p12), 130048   ;;  %vm1612_vm2 = vcmask (!%p243_p12), 261120  }
  0x22   : > { %1961 = vmatprep.subr.bf16.mxu1 (!%p243_p12), %v2220_v14  ;;  %1867 = vmatprep.mubr.msk.f32.mxu1 (!%p243_p12), %vm2221_vm0, %v2222_v16  ;;  %s2004_s13 = smul.u32 (!%p243_p12), 96, %s2334_s12  ;;  %s2224_s22 = smov (!%p243_p12), 16  }
  0x23   : > { %1960 = vmatpush3.bf16.msra.mxu0 (!%p243_p12), %v2317_v15  ;;  %1963 = vmatpush3.bf16.msra.mxu1 (!%p243_p12), %v2317_v15  ;;  %s2225_s23 = smov (!%p243_p12), 32   ;;  %s2226_s27 = smov (!%p243_p12), 80  }
  0x24   : > { %1964 = vmatprep.subr.bf16.mxu0 (!%p243_p12), %v2220_v14  ;;  %1967 = vmatprep.subr.bf16.mxu1 (!%p243_p12), %v2220_v14  ;;  %s2337_s14 = scalar_lea.vmem (!%p243_p12), [#allocation2], %s2004_s13  ;;  %s2227_s6 = smov (!%p243_p12), 64  }
  0x25   : > { %v278_v17 = vld [vmem:[%s2337_s14] sm:$0xff] (!%p243_p12)  ;;  %v1773_v35 = vld [vmem:[%s2337_s14 + $0x8] sm:$0xff] (!%p243_p12)  ;;  %v1776_v53 = vld [vmem:[%s2337_s14 + $0x10] sm:$0xff] (!%p243_p12)  ;;  %s1809_s28 = sshll.u32 (!%p243_p12), %s1765_s19, 7  ;;  %s2228_s19 = smov (!%p243_p12), [#allocation3]  }
  0x26   : > { %1861 = vmatmul.mubr.f32.vlgmr.msra.gmra.mrb[0].mxu0 (!%p243_p12), %v2222_v16  ;;  %v1779_v7 = vld [vmem:[%s2337_s14 + $0x18] sm:$0xff] (!%p243_p12)  ;;  %s2160_s8 = sshll.u32 (!%p243_p12), %s2228_s19, 4  ;;  %s2161_s8 = int_to_ptr.vmem [resolvable:$false] %s2160_s8 }
  0x27   : > { %1966 = vmatpush3.bf16.msra.mxu0 (!%p243_p12), %v2317_v15  ;;  %1874 = vmatprep.mubr.msk.f32.mxu0 (!%p243_p12), %vm2221_vm0, %v2222_v16  ;;  %s2162_s9 = scalar_lea.vmem (!%p243_p12), %s2161_s8, 256 }
  0x28   : > { %1970 = vmatprep.subr.bf16.mxu0 %v2220_v14 }
  0xf9   : > { %v349_v18 = vpop.f32.mrb[0].mxu0 }
  0xfa   : > { %v353_v19 = vadd.f32 %v349_v18, %v278_v17  ;;  %v1862_v20 = vpop.f32.mrb[1].mxu0 }
  0xfc   : > { %2052 = vtanh.f32 %v353_v19  ;;  %v1772_v22 = vmul.f32 -1.442695, %v353_v19 }
  0xfe   : > { %2054 = vpow2.f32 %v1772_v22 }
 0x106   : > { %v2053_v21 = vpop.eup %2052 }
 0x107   : > { %363 = vrot.lane.b32.xlu0 %v2053_v21, %s2223_s20 }
 0x108   : > { %v2055_v23 = vpop.eup %2054 }
 0x109   : > { %v357_v24 = vadd.f32 1.0, %v2055_v23 }
 0x10b   : > { %2056 = vrcp.f32 %v357_v24 }
 0x115   : > { %v2057_v25 = vpop.eup %2056 }
 0x116   : > { %v361_v28 = vmul.f32 0.0, %v2057_v25 }
 0x179   : > { %v364_v26 = vpop.permute.xlu0 %363 }
 0x17a   : > { %v366_v27 = vmul.f32 %v2057_v25, %v364_v26 }
 0x17c   : > { %368 = vrot.lane.b32.xlu0 %v366_v27, %s2224_s22 }
 0x1ee   : > { %v369_v29 = vpop.permute.xlu0 %368 }
 0x1ef   : > { %v371_v30 = vadd.f32 %v369_v29, %v361_v28  ;;  %v1782_v28 = vld [vmem:[%s2337_s14 + $0x20] sm:$0xff] }
 0x1f1   : > { %2058 = vtanh.f32 %v371_v30 }
 0x1fb   : > { %v2059_v31 = vpop.eup %2058 }
 0x1fc   : > { %374 = vrot.lane.b32.xlu1 %v2059_v31, %s2225_s23 }
 0x26e   : > { %v375_v32 = vpop.permute.xlu1 %374 }
 0x26f   : > { %v377_v33 = vmul.f32 %v2057_v25, %v375_v32 }
 0x271   : > { %381 = vrot.lane.b32.xlu1 %v377_v33, %s2226_s27 }
 0x2e3   : > { %v382_v34 = vpop.permute.xlu1 %381 }
 0x2e4   : > { %1868 = vmatmul.mubr.msk.f32.vlgmr.msra.gmra.mrb[0].mxu1 %vm279_vm1, %v382_v34 }
 0x2e5   : > { %1969 = vmatpush3.bf16.msra.mxu1 %v2317_v15  ;;  %1881 = vmatprep.mubr.msk.f32.mxu1 %vm2221_vm0, %v2222_v16 }
 0x2e6   : > { %1973 = vmatprep.subr.bf16.mxu1 %v2220_v14 }
 0x3b7   : > { %v451_v36 = vpop.f32.mrb[0].mxu1 }
 0x3b8   : > { %v455_v37 = vadd.f32 %v1773_v35, %v451_v36  ;;  %v1869_v38 = vpop.f32.mrb[1].mxu1 }
 0x3ba   : > { %2060 = vtanh.f32 %v455_v37  ;;  %v1775_v40 = vmul.f32 -1.442695, %v455_v37 }
 0x3bc   : > { %2062 = vpow2.f32 %v1775_v40 }
 0x3c4   : > { %v2061_v39 = vpop.eup %2060 }
 0x3c5   : > { %465 = vrot.lane.b32.xlu0 %v2061_v39, %s2223_s20 }
 0x3c6   : > { %v2063_v41 = vpop.eup %2062 }
 0x3c7   : > { %v459_v42 = vadd.f32 1.0, %v2063_v41 }
 0x3c9   : > { %2064 = vrcp.f32 %v459_v42 }
 0x3d3   : > { %v2065_v43 = vpop.eup %2064 }
 0x3d4   : > { %v463_v46 = vmul.f32 %v2065_v43, %v371_v30 }
 0x437   : > { %v466_v44 = vpop.permute.xlu0 %465 }
 0x438   : > { %v468_v45 = vmul.f32 %v2065_v43, %v466_v44 }
 0x43a   : > { %470 = vrot.lane.b32.xlu1 %v468_v45, %s2224_s22 }
 0x4ac   : > { %v471_v47 = vpop.permute.xlu1 %470 }
 0x4ad   : > { %v473_v48 = vadd.f32 %v471_v47, %v463_v46  ;;  %v1785_v46 = vld [vmem:[%s2337_s14 + $0x28] sm:$0xff] }
 0x4af   : > { %2066 = vtanh.f32 %v473_v48 }
 0x4b9   : > { %v2067_v49 = vpop.eup %2066 }
 0x4ba   : > { %476 = vrot.lane.b32.xlu0 %v2067_v49, %s2225_s23 }
 0x52c   : > { %v477_v50 = vpop.permute.xlu0 %476 }
 0x52d   : > { %v479_v51 = vmul.f32 %v2065_v43, %v477_v50 }
 0x52f   : > { %483 = vrot.lane.b32.xlu1 %v479_v51, %s2226_s27 }
 0x5a1   : > { %v484_v52 = vpop.permute.xlu1 %483 }
 0x5a2   : > { %1875 = vmatmul.mubr.msk.f32.vlgmr.msra.gmra.mrb[2].mxu0 %vm279_vm1, %v484_v52 }
 0x5a3   : > { %1972 = vmatpush3.bf16.msra.mxu0 %v2317_v15  ;;  %1888 = vmatprep.mubr.msk.f32.mxu0 %vm2221_vm0, %v2222_v16 }
 0x5a4   : > { %1976 = vmatprep.subr.bf16.mxu0 %v2220_v14 }
 0x675   : > { %v553_v54 = vpop.f32.mrb[2].mxu0 }
 0x676   : > { %v557_v55 = vadd.f32 %v1776_v53, %v553_v54  ;;  %v1876_v56 = vpop.f32.mrb[3].mxu0 }
 0x678   : > { %2068 = vtanh.f32 %v557_v55  ;;  %v1778_v58 = vmul.f32 -1.442695, %v557_v55 }
 0x67a   : > { %2070 = vpow2.f32 %v1778_v58 }
 0x682   : > { %v2069_v57 = vpop.eup %2068 }
 0x683   : > { %567 = vrot.lane.b32.xlu0 %v2069_v57, %s2223_s20 }
 0x684   : > { %v2071_v59 = vpop.eup %2070 }
 0x685   : > { %v561_v60 = vadd.f32 1.0, %v2071_v59 }
 0x687   : > { %2072 = vrcp.f32 %v561_v60 }
 0x691   : > { %v2073_v61 = vpop.eup %2072 }
 0x692   : > { %v565_v0 = vmul.f32 %v2073_v61, %v473_v48 }
 0x6f5   : > { %v568_v62 = vpop.permute.xlu0 %567 }
 0x6f6   : > { %v570_v63 = vmul.f32 %v2073_v61, %v568_v62 }
 0x6f8   : > { %572 = vrot.lane.b32.xlu1 %v570_v63, %s2224_s22 }
 0x76a   : > { %v573_v1 = vpop.permute.xlu1 %572 }
 0x76b   : > { %v575_v2 = vadd.f32 %v573_v1, %v565_v0  ;;  %v1788_v0 = vld [vmem:[%s2337_s14 + $0x30] sm:$0xff] }
 0x76d   : > { %2074 = vtanh.f32 %v575_v2 }
 0x777   : > { %v2075_v3 = vpop.eup %2074 }
 0x778   : > { %578 = vrot.lane.b32.xlu0 %v2075_v3, %s2225_s23 }
 0x7ea   : > { %v579_v4 = vpop.permute.xlu0 %578 }
 0x7eb   : > { %v581_v5 = vmul.f32 %v2073_v61, %v579_v4 }
 0x7ed   : > { %585 = vrot.lane.b32.xlu1 %v581_v5, %s2226_s27 }
 0x85f   : > { %v586_v6 = vpop.permute.xlu1 %585 }
 0x860   : > { %1882 = vmatmul.mubr.msk.f32.vlgmr.msra.gmra.mrb[2].mxu1 %vm279_vm1, %v586_v6 }
 0x861   : > { %1975 = vmatpush3.bf16.msra.mxu1 %v2317_v15  ;;  %1895 = vmatprep.mubr.msk.f32.mxu1 %vm2221_vm0, %v2222_v16 }
 0x862   : > { %1979 = vmatprep.subr.bf16.mxu1 %v2220_v14 }
 0x933   : > { %v655_v8 = vpop.f32.mrb[2].mxu1 }
 0x934   : > { %v659_v9 = vadd.f32 %v1779_v7, %v655_v8  ;;  %v1883_v10 = vpop.f32.mrb[3].mxu1 }
 0x936   : > { %2076 = vtanh.f32 %v659_v9  ;;  %v1781_v12 = vmul.f32 -1.442695, %v659_v9 }
 0x938   : > { %2078 = vpow2.f32 %v1781_v12 }
 0x940   : > { %v2077_v11 = vpop.eup %2076 }
 0x941   : > { %669 = vrot.lane.b32.xlu0 %v2077_v11, %s2223_s20 }
 0x942   : > { %v2079_v13 = vpop.eup %2078 }
 0x943   : > { %v663_v17 = vadd.f32 1.0, %v2079_v13 }
 0x945   : > { %2080 = vrcp.f32 %v663_v17 }
 0x94f   : > { %v2081_v18 = vpop.eup %2080 }
 0x950   : > { %v667_v21 = vmul.f32 %v2081_v18, %v575_v2 }
 0x9b3   : > { %v670_v19 = vpop.permute.xlu0 %669 }
 0x9b4   : > { %v672_v20 = vmul.f32 %v2081_v18, %v670_v19 }
 0x9b6   : > { %674 = vrot.lane.b32.xlu1 %v672_v20, %s2224_s22 }
 0xa28   : > { %v675_v22 = vpop.permute.xlu1 %674 }
 0xa29   : > { %v677_v23 = vadd.f32 %v675_v22, %v667_v21  ;;  %v1791_v21 = vld [vmem:[%s2337_s14 + $0x38] sm:$0xff] }
 0xa2b   : > { %2082 = vtanh.f32 %v677_v23 }
 0xa35   : > { %v2083_v24 = vpop.eup %2082 }
 0xa36   : > { %680 = vrot.lane.b32.xlu0 %v2083_v24, %s2225_s23 }
 0xaa8   : > { %v681_v25 = vpop.permute.xlu0 %680 }
 0xaa9   : > { %v683_v26 = vmul.f32 %v2081_v18, %v681_v25 }
 0xaab   : > { %687 = vrot.lane.b32.xlu1 %v683_v26, %s2226_s27 }
 0xb1d   : > { %v688_v27 = vpop.permute.xlu1 %687 }
 0xb1e   : > { %1889 = vmatmul.mubr.msk.f32.vlgmr.msra.gmra.mrb[4].mxu0 %vm279_vm1, %v688_v27 }
 0xb1f   : > { %1978 = vmatpush3.bf16.msra.mxu0 %v2317_v15  ;;  %1902 = vmatprep.mubr.msk.f32.mxu0 %vm2221_vm0, %v2222_v16 }
 0xb20   : > { %1982 = vmatprep.subr.bf16.mxu0 %v2220_v14 }
 0xbf1   : > { %v757_v29 = vpop.f32.mrb[4].mxu0 }
 0xbf2   : > { %v761_v30 = vadd.f32 %v1782_v28, %v757_v29  ;;  %v1890_v31 = vpop.f32.mrb[5].mxu0 }
 0xbf4   : > { %2084 = vtanh.f32 %v761_v30  ;;  %v1784_v33 = vmul.f32 -1.442695, %v761_v30 }
 0xbf6   : > { %2086 = vpow2.f32 %v1784_v33 }
 0xbfe   : > { %v2085_v32 = vpop.eup %2084 }
 0xbff   : > { %771 = vrot.lane.b32.xlu0 %v2085_v32, %s2223_s20 }
 0xc00   : > { %v2087_v34 = vpop.eup %2086 }
 0xc01   : > { %v765_v35 = vadd.f32 1.0, %v2087_v34 }
 0xc03   : > { %2088 = vrcp.f32 %v765_v35 }
 0xc0d   : > { %v2089_v36 = vpop.eup %2088 }
 0xc0e   : > { %v769_v39 = vmul.f32 %v2089_v36, %v677_v23 }
 0xc71   : > { %v772_v37 = vpop.permute.xlu0 %771 }
 0xc72   : > { %v774_v38 = vmul.f32 %v2089_v36, %v772_v37 }
 0xc74   : > { %776 = vrot.lane.b32.xlu1 %v774_v38, %s2224_s22 }
 0xce6   : > { %v777_v40 = vpop.permute.xlu1 %776 }
 0xce7   : > { %v779_v41 = vadd.f32 %v777_v40, %v769_v39  ;;  %v1794_v39 = vld [vmem:[%s2337_s14 + $0x40] sm:$0xff] }
 0xce9   : > { %2090 = vtanh.f32 %v779_v41 }
 0xcf3   : > { %v2091_v42 = vpop.eup %2090 }
 0xcf4   : > { %782 = vrot.lane.b32.xlu0 %v2091_v42, %s2225_s23 }
 0xd66   : > { %v783_v43 = vpop.permute.xlu0 %782 }
 0xd67   : > { %v785_v44 = vmul.f32 %v2089_v36, %v783_v43 }
 0xd69   : > { %789 = vrot.lane.b32.xlu1 %v785_v44, %s2226_s27 }
 0xddb   : > { %v790_v45 = vpop.permute.xlu1 %789 }
 0xddc   : > { %1896 = vmatmul.mubr.msk.f32.vlgmr.msra.gmra.mrb[4].mxu1 %vm279_vm1, %v790_v45 }
 0xddd   : > { %1981 = vmatpush3.bf16.msra.mxu1 %v2317_v15  ;;  %1909 = vmatprep.mubr.msk.f32.mxu1 %vm2221_vm0, %v2222_v16 }
 0xdde   : > { %1985 = vmatprep.subr.bf16.mxu1 %v2220_v14 }
 0xeaf   : > { %v859_v47 = vpop.f32.mrb[4].mxu1 }
 0xeb0   : > { %v863_v48 = vadd.f32 %v1785_v46, %v859_v47  ;;  %v1897_v49 = vpop.f32.mrb[5].mxu1 }
 0xeb2   : > { %2092 = vtanh.f32 %v863_v48  ;;  %v1787_v51 = vmul.f32 -1.442695, %v863_v48 }
 0xeb4   : > { %2094 = vpow2.f32 %v1787_v51 }
 0xebc   : > { %v2093_v50 = vpop.eup %2092 }
 0xebd   : > { %873 = vrot.lane.b32.xlu0 %v2093_v50, %s2223_s20 }
 0xebe   : > { %v2095_v52 = vpop.eup %2094 }
 0xebf   : > { %v867_v53 = vadd.f32 1.0, %v2095_v52 }
 0xec1   : > { %2096 = vrcp.f32 %v867_v53 }
 0xecb   : > { %v2097_v54 = vpop.eup %2096 }
 0xecc   : > { %v871_v57 = vmul.f32 %v2097_v54, %v779_v41 }
 0xf2f   : > { %v874_v55 = vpop.permute.xlu0 %873 }
 0xf30   : > { %v876_v56 = vmul.f32 %v2097_v54, %v874_v55 }
 0xf32   : > { %878 = vrot.lane.b32.xlu1 %v876_v56, %s2224_s22 }
 0xfa4   : > { %v879_v58 = vpop.permute.xlu1 %878 }
 0xfa5   : > { %v881_v59 = vadd.f32 %v879_v58, %v871_v57  ;;  %v1797_v57 = vld [vmem:[%s2337_s14 + $0x48] sm:$0xff] }
 0xfa7   : > { %2098 = vtanh.f32 %v881_v59 }
 0xfb1   : > { %v2099_v60 = vpop.eup %2098 }
 0xfb2   : > { %884 = vrot.lane.b32.xlu0 %v2099_v60, %s2225_s23 }
0x1024   : > { %v885_v61 = vpop.permute.xlu0 %884 }
0x1025   : > { %v887_v62 = vmul.f32 %v2097_v54, %v885_v61 }
0x1027   : > { %891 = vrot.lane.b32.xlu1 %v887_v62, %s2226_s27 }
0x1099   : > { %v892_v63 = vpop.permute.xlu1 %891 }
0x109a   : > { %1903 = vmatmul.mubr.msk.f32.vlgmr.msra.gmra.mrb[6].mxu0 %vm279_vm1, %v892_v63 }
0x109b   : > { %1984 = vmatpush3.bf16.msra.mxu0 %v2317_v15  ;;  %1916 = vmatprep.mubr.msk.f32.mxu0 %vm2221_vm0, %v2222_v16 }
0x109c   : > { %1988 = vmatprep.subr.bf16.mxu0 %v2220_v14 }
0x116d   : > { %v961_v1 = vpop.f32.mrb[6].mxu0 }
0x116e   : > { %v965_v2 = vadd.f32 %v1788_v0, %v961_v1  ;;  %v1904_v3 = vpop.f32.mrb[7].mxu0 }
0x1170   : > { %2100 = vtanh.f32 %v965_v2  ;;  %v1790_v5 = vmul.f32 -1.442695, %v965_v2 }
0x1172   : > { %2102 = vpow2.f32 %v1790_v5 }
0x117a   : > { %v2101_v4 = vpop.eup %2100 }
0x117b   : > { %975 = vrot.lane.b32.xlu0 %v2101_v4, %s2223_s20 }
0x117c   : > { %v2103_v6 = vpop.eup %2102 }
0x117d   : > { %v969_v7 = vadd.f32 1.0, %v2103_v6 }
0x117f   : > { %2104 = vrcp.f32 %v969_v7 }
0x1189   : > { %v2105_v8 = vpop.eup %2104 }
0x118a   : > { %v973_v11 = vmul.f32 %v2105_v8, %v881_v59 }
0x11ed   : > { %v976_v9 = vpop.permute.xlu0 %975 }
0x11ee   : > { %v978_v10 = vmul.f32 %v2105_v8, %v976_v9 }
0x11f0   : > { %980 = vrot.lane.b32.xlu1 %v978_v10, %s2224_s22  ;;  %v276_v10 = vld [vmem:[%s2528_s2] sm:$0xff] }
0x1262   : > { %v981_v12 = vpop.permute.xlu1 %980 }
0x1263   : > { %v983_v13 = vadd.f32 %v981_v12, %v973_v11  ;;  %v277_v11 = vld [vmem:[%s2528_s2 + $0x8] sm:$0xff] }
0x1264   : > { %v1995_v12 = vpack.c.bf16 %v277_v11, %v276_v10 }
0x1265   : > { %2106 = vtanh.f32 %v983_v13 }
0x126f   : > { %v2107_v17 = vpop.eup %2106 }
0x1270   : > { %986 = vrot.lane.b32.xlu0 %v2107_v17, %s2225_s23 }
0x12e2   : > { %v987_v18 = vpop.permute.xlu0 %986 }
0x12e3   : > { %v989_v19 = vmul.f32 %v2105_v8, %v987_v18 }
0x12e5   : > { %993 = vrot.lane.b32.xlu1 %v989_v19, %s2226_s27 }
0x1357   : > { %v994_v20 = vpop.permute.xlu1 %993 }
0x1358   : > { %1910 = vmatmul.mubr.msk.f32.vlgmr.msra.gmra.mrb[6].mxu1 %vm279_vm1, %v994_v20 }
0x1359   : > { %1987 = vmatpush3.bf16.msra.mxu1 %v2317_v15  ;;  %1923 = vmatprep.mubr.msk.f32.mxu1 %vm2221_vm0, %v2222_v16 }
0x135a   : > { %1991 = vmatprep.subr.bf16.mxu1 %v2220_v14 }
0x142b   : > { %v1063_v22 = vpop.f32.mrb[6].mxu1 }
0x142c   : > { %v1067_v23 = vadd.f32 %v1791_v21, %v1063_v22  ;;  %v1911_v24 = vpop.f32.mrb[7].mxu1 }
0x142e   : > { %2108 = vtanh.f32 %v1067_v23  ;;  %v1793_v26 = vmul.f32 -1.442695, %v1067_v23 }
0x1430   : > { %2110 = vpow2.f32 %v1793_v26 }
0x1438   : > { %v2109_v25 = vpop.eup %2108 }
0x1439   : > { %1077 = vrot.lane.b32.xlu0 %v2109_v25, %s2223_s20 }
0x143a   : > { %v2111_v27 = vpop.eup %2110 }
0x143b   : > { %v1071_v28 = vadd.f32 1.0, %v2111_v27 }
0x143d   : > { %2112 = vrcp.f32 %v1071_v28 }
0x1447   : > { %v2113_v29 = vpop.eup %2112 }
0x1448   : > { %v1075_v32 = vmul.f32 %v2113_v29, %v983_v13  ;;  %v1800_v13 = vld [vmem:[%s2337_s14 + $0x50] sm:$0xff] }
0x14ab   : > { %v1078_v30 = vpop.permute.xlu0 %1077 }
0x14ac   : > { %v1080_v31 = vmul.f32 %v2113_v29, %v1078_v30 }
0x14ae   : > { %1082 = vrot.lane.b32.xlu1 %v1080_v31, %s2224_s22 }
0x1520   : > { %v1083_v33 = vpop.permute.xlu1 %1082 }
0x1521   : > { %v1085_v34 = vadd.f32 %v1083_v33, %v1075_v32 }
0x1523   : > { %2114 = vtanh.f32 %v1085_v34 }
0x152d   : > { %v2115_v35 = vpop.eup %2114 }
0x152e   : > { %1088 = vrot.lane.b32.xlu0 %v2115_v35, %s2225_s23  ;;  %v1803_v35 = vld [vmem:[%s2337_s14 + $0x58] sm:$0xff] }
0x15a0   : > { %v1089_v36 = vpop.permute.xlu0 %1088 }
0x15a1   : > { %v1091_v37 = vmul.f32 %v2113_v29, %v1089_v36 }
0x15a3   : > { %1095 = vrot.lane.b32.xlu1 %v1091_v37, %s2226_s27 }
0x1615   : > { %v1096_v38 = vpop.permute.xlu1 %1095 }
0x1616   : > { %1917 = vmatmul.mubr.msk.f32.vlgmr.msra.gmra.mrb[8].mxu0 %vm279_vm1, %v1096_v38 }
0x1617   : > { %1990 = vmatpush3.bf16.msra.mxu0 %v2317_v15  ;;  %1930 = vmatprep.mubr.msk.f32.mxu0 %vm2221_vm0, %v2222_v16 }
0x1618   : > { %1994 = vmatprep.subr.bf16.mxu0 %v2220_v14 }
0x16e9   : > { %v1165_v40 = vpop.f32.mrb[8].mxu0 }
0x16ea   : > { %v1169_v41 = vadd.f32 %v1794_v39, %v1165_v40  ;;  %v1918_v42 = vpop.f32.mrb[9].mxu0 }
0x16ec   : > { %2116 = vtanh.f32 %v1169_v41  ;;  %v1796_v44 = vmul.f32 -1.442695, %v1169_v41 }
0x16ee   : > { %2118 = vpow2.f32 %v1796_v44 }
0x16f6   : > { %v2117_v43 = vpop.eup %2116 }
0x16f7   : > { %1179 = vrot.lane.b32.xlu0 %v2117_v43, %s2223_s20 }
0x16f8   : > { %v2119_v45 = vpop.eup %2118 }
0x16f9   : > { %v1173_v46 = vadd.f32 1.0, %v2119_v45 }
0x16fb   : > { %2120 = vrcp.f32 %v1173_v46 }
0x1705   : > { %v2121_v47 = vpop.eup %2120 }
0x1706   : > { %v1177_v50 = vmul.f32 %v2121_v47, %v1085_v34 }
0x1769   : > { %v1180_v48 = vpop.permute.xlu0 %1179 }
0x176a   : > { %v1182_v49 = vmul.f32 %v2121_v47, %v1180_v48 }
0x176c   : > { %1184 = vrot.lane.b32.xlu1 %v1182_v49, %s2224_s22 }
0x17de   : > { %v1185_v51 = vpop.permute.xlu1 %1184 }
0x17df   : > { %v1187_v52 = vadd.f32 %v1185_v51, %v1177_v50 }
0x17e1   : > { %2122 = vtanh.f32 %v1187_v52 }
0x17eb   : > { %v2123_v53 = vpop.eup %2122 }
0x17ec   : > { %1190 = vrot.lane.b32.xlu0 %v2123_v53, %s2225_s23 }
0x185e   : > { %v1191_v54 = vpop.permute.xlu0 %1190 }
0x185f   : > { %v1193_v55 = vmul.f32 %v2121_v47, %v1191_v54 }
0x1861   : > { %1197 = vrot.lane.b32.xlu1 %v1193_v55, %s2226_s27 }
0x18d3   : > { %v1198_v56 = vpop.permute.xlu1 %1197 }
0x18d4   : > { %1924 = vmatmul.mubr.msk.f32.vlgmr.msra.gmra.mrb[8].mxu1 %vm279_vm1, %v1198_v56 }
0x18d5   : > { %1993 = vmatpush3.bf16.msra.mxu1 %v2317_v15  ;;  %1937 = vmatprep.mubr.msk.f32.mxu1 %vm2221_vm0, %v2222_v16 }
0x18d6   : > { %1997 = vmatprep.subr.bf16.mxu1 %v2220_v14 }
0x19a7   : > { %v1267_v58 = vpop.f32.mrb[8].mxu1 }
0x19a8   : > { %v1271_v59 = vadd.f32 %v1797_v57, %v1267_v58  ;;  %v1925_v60 = vpop.f32.mrb[9].mxu1 }
0x19aa   : > { %2124 = vtanh.f32 %v1271_v59  ;;  %v1799_v62 = vmul.f32 -1.442695, %v1271_v59 }
0x19ac   : > { %2126 = vpow2.f32 %v1799_v62 }
0x19b4   : > { %v2125_v61 = vpop.eup %2124 }
0x19b5   : > { %1281 = vrot.lane.b32.xlu0 %v2125_v61, %s2223_s20 }
0x19b6   : > { %v2127_v63 = vpop.eup %2126 }
0x19b7   : > { %v1275_v0 = vadd.f32 1.0, %v2127_v63 }
0x19b9   : > { %2128 = vrcp.f32 %v1275_v0  ;;  %v1608_v0 = vld [vmem:[%s2529_s3] sm:$0xff] }
0x19c3   : > { %v2129_v1 = vpop.eup %2128 }
0x19c4   : > { %v1279_v3 = vmul.f32 %v2129_v1, %v1187_v52 }
0x1a27   : > { %v1282_v15 = vpop.permute.xlu0 %1281 }
0x1a28   : > { %v1284_v2 = vmul.f32 %v2129_v1, %v1282_v15  ;;  %v1610_v15 = vld [vmem:[%s2529_s3 + $0x10] sm:$0xff] }
0x1a2a   : > { %1286 = vrot.lane.b32.xlu1 %v1284_v2, %s2224_s22 }
0x1a9c   : > { %v1287_v4 = vpop.permute.xlu1 %1286 }
0x1a9d   : > { %v1289_v5 = vadd.f32 %v1287_v4, %v1279_v3  ;;  %v1611_v3 = vld [vmem:[%s2529_s3 + $0x18] sm:$0xff] }
0x1a9e   : > { %v2001_v4 = vpack.c.bf16 %v1611_v3, %v1610_v15 }
0x1a9f   : > { %2130 = vtanh.f32 %v1289_v5 }
0x1aa9   : > { %v2131_v6 = vpop.eup %2130 }
0x1aaa   : > { %1292 = vrot.lane.b32.xlu0 %v2131_v6, %s2225_s23 }
0x1b1c   : > { %v1293_v7 = vpop.permute.xlu0 %1292 }
0x1b1d   : > { %v1295_v8 = vmul.f32 %v2129_v1, %v1293_v7  ;;  %v1609_v1 = vld [vmem:[%s2529_s3 + $0x8] sm:$0xff] }
0x1b1e   : > { %v1998_v2 = vpack.c.bf16 %v1609_v1, %v1608_v0 }
0x1b1f   : > { %1299 = vrot.lane.b32.xlu1 %v1295_v8, %s2226_s27 }
0x1b91   : > { %v1300_v9 = vpop.permute.xlu1 %1299 }
0x1b92   : > { %1931 = vmatmul.mubr.msk.f32.vlgmr.msra.gmra.mrb[10].mxu0 %vm279_vm1, %v1300_v9 }
0x1b93   : > { %1944 = vmatprep.mubr.msk.f32.mxu0 %vm2221_vm0, %v2222_v16  ;;  %1996 = vmatpush3.bf16.msra.mxu0 %v1995_v12 }
0x1b96   : > { %1945 = vmatmul.mubr.f32.vlgmr.msra.gmra.mrb[12].mxu0 %v2222_v16 }
0x1c65   : > { %v1369_v17 = vpop.f32.mrb[10].mxu0 }
0x1c66   : > { %v1373_v18 = vadd.f32 %v1800_v13, %v1369_v17  ;;  %v1932_v19 = vpop.f32.mrb[11].mxu0 }
0x1c68   : > { %2132 = vtanh.f32 %v1373_v18  ;;  %v1802_v21 = vmul.f32 -1.442695, %v1373_v18 }
0x1c69   : > { %v1566_v27 = vpop.f32.mrb[12].mxu0 }
0x1c6a   : > { %2134 = vpow2.f32 %v1802_v21  ;;  %v1946_v28 = vpop.f32.mrb[13].mxu0 }
0x1c72   : > { %v2133_v20 = vpop.eup %2132 }
0x1c73   : > { %1383 = vrot.lane.b32.xlu0 %v2133_v20, %s2223_s20 }
0x1c74   : > { %v2135_v22 = vpop.eup %2134 }
0x1c75   : > { %v1377_v23 = vadd.f32 1.0, %v2135_v22 }
0x1c77   : > { %2136 = vrcp.f32 %v1377_v23 }
0x1c81   : > { %v2137_v24 = vpop.eup %2136 }
0x1c82   : > { %v1381_v29 = vmul.f32 %v2137_v24, %v1289_v5 }
0x1ce5   : > { %v1384_v25 = vpop.permute.xlu0 %1383 }
0x1ce6   : > { %v1386_v26 = vmul.f32 %v2137_v24, %v1384_v25 }
0x1ce8   : > { %1388 = vrot.lane.b32.xlu1 %v1386_v26, %s2224_s22 }
0x1d5a   : > { %v1389_v30 = vpop.permute.xlu1 %1388 }
0x1d5b   : > { %v1391_v31 = vadd.f32 %v1389_v30, %v1381_v29 }
0x1d5d   : > { %2138 = vtanh.f32 %v1391_v31 }
0x1d67   : > { %v2139_v32 = vpop.eup %2138 }
0x1d68   : > { %1394 = vrot.lane.b32.xlu0 %v2139_v32, %s2225_s23 }
0x1d6c   : > { %1571 = vrot.lane.b32.xlu0 %v1566_v27, %s2227_s6 }
0x1dda   : > { %v1395_v33 = vpop.permute.xlu0 %1394 }
0x1ddb   : > { %v1397_v34 = vmul.f32 %v2137_v24, %v1395_v33 }
0x1ddd   : > { %1401 = vrot.lane.b32.xlu1 %v1397_v34, %s2226_s27 }
0x1dde   : > { %v1572_v36 = vpop.permute.xlu0 %1571 }
0x1ddf   : > { %v1574_v37 = vadd.f32 %v1803_v35, %v1572_v36 }
0x1de1   : > { %2140 = vtanh.f32 %v1574_v37  ;;  %v1806_v39 = vmul.f32 -1.442695, %v1574_v37 }
0x1de3   : > { %2142 = vpow2.f32 %v1806_v39 }
0x1deb   : > { %v2141_v38 = vpop.eup %2140 }
0x1dec   : > { %1584 = vrot.lane.b32.xlu0 %v2141_v38, %s2223_s20 }
0x1ded   : > { %v2143_v40 = vpop.eup %2142 }
0x1dee   : > { %v1578_v41 = vadd.f32 1.0, %v2143_v40 }
0x1df0   : > { %2144 = vrcp.f32 %v1578_v41 }
0x1dfa   : > { %v2145_v43 = vpop.eup %2144 }
0x1dfb   : > { %v1582_v46 = vmul.f32 0.0, %v2145_v43 }
0x1e4f   : > { %v1402_v42 = vpop.permute.xlu1 %1401 }
0x1e50   : > { %1938 = vmatmul.mubr.msk.f32.vlgmr.msra.gmra.mrb[10].mxu1 %vm279_vm1, %v1402_v42 }
0x1e51   : > { %1955 = vmatprep.mubr.msk.f32.mxu1 %vm2221_vm0, %v2222_v16  ;;  %1999 = vmatpush3.bf16.msra.mxu1 %v1998_v2 }
0x1e52   : > { %2000 = vmatprep.subr.bf16.mxu1 %v2220_v14 }
0x1e55   : > { %2002 = vmatpush3.bf16.msra.mxu1 %v2001_v4 }
0x1e5e   : > { %v1585_v44 = vpop.permute.xlu0 %1584 }
0x1e5f   : > { %v1587_v45 = vmul.f32 %v2145_v43, %v1585_v44 }
0x1e61   : > { %1589 = vrot.lane.b32.xlu0 %v1587_v45, %s2224_s22 }
0x1ed3   : > { %v1590_v47 = vpop.permute.xlu0 %1589 }
0x1ed4   : > { %v1592_v48 = vadd.f32 %v1590_v47, %v1582_v46 }
0x1ed6   : > { %2146 = vtanh.f32 %v1592_v48 }
0x1ee0   : > { %v2147_v49 = vpop.eup %2146 }
0x1ee1   : > { %1595 = vrot.lane.b32.xlu0 %v2147_v49, %s2225_s23 }
0x1f23   : > { %v1471_v50 = vpop.f32.mrb[10].mxu1 }
0x1f24   : > { %v1475_v51 = vadd.f32 %v1803_v35, %v1471_v50  ;;  %v1939_v52 = vpop.f32.mrb[11].mxu1 }
0x1f26   : > { %2148 = vtanh.f32 %v1475_v51  ;;  %v1805_v55 = vmul.f32 -1.442695, %v1475_v51 }
0x1f28   : > { %2150 = vpow2.f32 %v1805_v55 }
0x1f30   : > { %v2149_v53 = vpop.eup %2148 }
0x1f31   : > { %1485 = vrot.lane.b32.xlu1 %v2149_v53, %s2223_s20 }
0x1f32   : > { %v2151_v56 = vpop.eup %2150 }
0x1f33   : > { %v1479_v57 = vadd.f32 1.0, %v2151_v56 }
0x1f35   : > { %2152 = vrcp.f32 %v1479_v57 }
0x1f3f   : > { %v2153_v58 = vpop.eup %2152 }
0x1f40   : > { %v1483_v61 = vmul.f32 %v2153_v58, %v1391_v31 }
0x1f53   : > { %v1596_v16 = vpop.permute.xlu0 %1595 }
0x1f54   : > { %v1598_v54 = vmul.f32 %v2145_v43, %v1596_v16 }
0x1f56   : > { %1604 = vrot.lane.b32.xlu0 %v1598_v54, %s2225_s23 }
0x1fa3   : > { %v1486_v59 = vpop.permute.xlu1 %1485 }
0x1fa4   : > { %v1488_v60 = vmul.f32 %v2153_v58, %v1486_v59 }
0x1fa6   : > { %1490 = vrot.lane.b32.xlu1 %v1488_v60, %s2224_s22  ;;  %s1771_s22 = sshll.u32 %s2334_s12, 3 }
0x1fa7   : > { %s273_s29 = scalar_lea.vmem [#allocation3], %s1771_s22 }
0x1fa8   : > { %s1701_s30 = sshll.u32 %s273_s29, 4  ;;  %s2483_s30 = int_to_ptr.vmem [resolvable:$true] %s1701_s30 }
0x1fa9   : > { %s2156_s7 = scalar_lea.vmem %s2483_s30, 128  ;;  %p2163_p2 = scmp.lt.s32.totalorder %s2483_s30, %s2161_s8 }
0x1faa   : > { %p2157_p13 = scmp.ne.s32.totalorder %s2483_s30, %s2156_s7  ;;  %p2164_p3 = scmp.lt.s32.totalorder %s2162_s9, %s2156_s7 }
0x1fac   : > { %p2158_p0 = pnand %p2157_p13, %p2292_p6  ;;  %p2165_p4 = por %p2164_p3, %p2163_p2 }
0x1fae   : > { %p2159_p1 = pneg %p2158_p0 }
0x1fb0   : > { %p2166_p5 = pnand %p2165_p4, %p2159_p1 }
0x1fc8   : > { %v1605_v8 = vpop.permute.xlu0 %1604 }
0x2018   : > { %v1491_v62 = vpop.permute.xlu1 %1490 }
0x2019   : > { %v1493_v63 = vadd.f32 %v1491_v62, %v1483_v61 }
0x201b   : > { %2154 = vtanh.f32 %v1493_v63 }
0x2025   : > { %v2155_v5 = vpop.eup %2154 }
0x2026   : > { %1496 = vrot.lane.b32.xlu1 %v2155_v5, %s2225_s23  ;;  %s2481_s23 = scalar_lea.hbm %s2530_s4, %s1809_s28 }
0x2098   : > { %v1497_v6 = vpop.permute.xlu1 %1496 }
0x2099   : > { %v1499_v7 = vmul.f32 %v2153_v58, %v1497_v6 }
0x209b   : > { %1600 = vrot.lane.b32.xlu1 %v1499_v7, %s2226_s27  ;;  %s1688_s27 = scalar_lea.sflag [#allocation4], %s2334_s12 }
0x210d   : > { %v1601_v9 = vpop.permute.xlu1 %1600 }
0x210e   : > { %v1607_v10 = vsel %vm279_vm1, %v1601_v9, %v1605_v8 }
0x210f   : > { %1956 = vmatmul.mubr.msk.f32.vlgmr.msra.gmra.mrb[12].mxu1 %vm1612_vm2, %v1607_v10 }
0x21e2   : > { %v1682_v14 = vpop.f32.mrb[12].mxu1 }
0x21e3   : > { %1686 = vst.msk [vmem:[%s273_s29] sm:$0xff] %vm279_vm1, %v1682_v14  ;;  %v1957_v11 = vpop.f32.mrb[13].mxu1 }
0x21e4   : > { %2169 = shalt.err (!%p2166_p5)
}
0x21e5   : > { %s2170_s12 = scalar_lea.hbm %s2481_s23, 128  ;;  %s2174_s13 = scalar_lea.hbm %s2530_s4, 256 }
0x21e6   : > { %p2171_p7 = scmp.ne.s32.totalorder %s2481_s23, %s2170_s12  ;;  %p2175_p12 = scmp.lt.u32.totalorder %s2481_s23, %s2530_s4 }
0x21e7   : > { %p2176_p13 = scmp.lt.u32.totalorder %s2174_s13, %s2170_s12  ;;  %p2178_p1 = scmp.lt.u32.totalorder %s2170_s12, %s2481_s23 }
0x21e8   : > { %p2172_p10 = pnand %p2171_p7, %p2292_p6 }
0x21e9   : > { %p2177_p0 = por %p2176_p13, %p2175_p12 }
0x21ea   : > { %p2173_p11 = pneg %p2172_p10 }
0x21eb   : > { %p2179_p2 = por %p2178_p1, %p2177_p0 }
0x21ed   : > { %p2180_p3 = pnand %p2179_p2, %p2173_p11 }
0x21ef   : > { %2183 = shalt.err (!%p2180_p3)
}
0x21f0   : > { %2005 = dma.vmem_to_hbm [thread:$0]  (%p2292_p6), %s2483_s30, 128, %s2481_s23, %s1688_s27  }
0x21f1 PF: > { %s1713_s22 = sand.u32 1, %s2206_s15   ;;  %p2008_p4 = pnand %p1768_p9, %p2296_p8 }
0x21f2   : > { %s1714_s28 = scalar_lea.sflag [#allocation4], %s1713_s22 }
0x21f3   : > { %2201 = dma.done.wait (!%p2008_p4), %s1714_s28, 128  }
0x21f4   : > { %2203 = vsyncadd (!%p2008_p4), %s1714_s28, 4294967168  ;;  %p14_p5 = scmp.ge.s32.totalorder %s2277_s21, 4   ;;  %s2533_s15 = smov %s2210_s16 }
0x21f5   : > { %s2534_s16 = smov %s2214_s17  ;;  %s2535_s17 = smov %s2290_s24 }
0x21f6   : > { %s2536_s18 = smov %s2277_s21  ;;  %16 = sbr.rel (!%p14_p5) target bundleno = 3 (0x3), region = 125 }
0x21fd   :  { %1719 = vsyncpa [#allocation4], 1 }
0x21fe   :  { %1721 = vsyncpa [#allocation4 + $0x1], 1 }

</bundles_post_ra>
